<compile_context>
chip_gen: v5e
topology: v5e:2x2
jax: 0.10.0
libtpu: 0.0.40
codegen_flags: <defaults>
</compile_context>

<pallas_src>
import jax
import jax.numpy as jnp
from jax.experimental import pallas as pl
from jax.experimental.pallas import tpu as pltpu


def _round_up(n, m):
    return ((n + m - 1) // m) * m


# ---------------------------------------------------------------------------
# Pallas kernel: one (tm, Kp) tile of patch vectors x resident (Kp, Ep) weight
# ---------------------------------------------------------------------------
def _patch_proj_kernel(x_ref, w_ref, b_ref, o_ref):
    acc = jnp.dot(x_ref[...], w_ref[...], preferred_element_type=jnp.float32)
    o_ref[...] = (acc + b_ref[...]).astype(o_ref.dtype)


# ---------------------------------------------------------------------------
# Exact replica of WrapConv2d.pad (NCHW): circular wrap in W, flipped pad in H.
# Mirrors the PyTorch code line-for-line (including that pad_size[0][1] rows
# pad the top and pad_size[0][0] rows pad the bottom), so asymmetric pads
# behave identically to the reference module.
# ---------------------------------------------------------------------------
def _wrap_pad_2d(x, pad_size):
    (ph0, ph1), (pw0, pw1) = pad_size
    left_padding = x[..., -pw0:]
    right_padding = x[..., :pw1]
    x = jnp.concatenate([left_padding, x, right_padding], axis=-1)
    upper_padding = jnp.flip(x[:, :, -ph0:, :], axis=-2)
    lower_padding = jnp.flip(x[:, :, :ph1, :], axis=-2)
    x = jnp.concatenate([lower_padding, x, upper_padding], axis=-2)
    return x


# ---------------------------------------------------------------------------
# PatchEmbed(dim=2) forward
# ---------------------------------------------------------------------------
def patch_embed_2d(x, weight, bias, patch_size, pad_size, *, tm=512,
                   compute_dtype=None):
    """x: (B, C, H, W); weight: (E, C, ph, pw) [PyTorch OIHW]; bias: (E,).

    Returns (B, H'*W', E), identical semantics to
    PatchEmbed(dim=2).forward(x, pad_size)  ==  proj(x).flatten(2).transpose(1, 2).

    compute_dtype: dtype the token matrix / weight are streamed in (e.g.
    jnp.bfloat16 for production); accumulation is always f32 on the MXU.
    """
    out_dtype = x.dtype
    if compute_dtype is None:
        compute_dtype = x.dtype

    if pad_size is not None:
        x = _wrap_pad_2d(x, pad_size)

    B, C, H, W = x.shape
    ph, pw = patch_size
    Ho = (H - ph) // ph + 1
    Wo = (W - pw) // pw + 1
    E = weight.shape[0]

    # TODO(synk): the remaining large win is folding the pad + patch extraction
    # into the kernel (image kept in HBM via memory_space=pl.ANY, per-strip
    # manual DMA), removing the whole-image copies below.
    # Patchify: VALID crop, (B,C,Ho,ph,Wo,pw) -> (B,Ho,Wo,C,ph,pw) -> (M, K).
    # Patch-vector ordering (c, kh, kw) matches PyTorch conv weight layout.
    x = x[:, :, : Ho * ph, : Wo * pw]
    x = x.reshape(B, C, Ho, ph, Wo, pw).transpose(0, 2, 4, 1, 3, 5)

    M = B * Ho * Wo
    K = C * ph * pw
    Kp = _round_up(K, 128)   # lane-align contraction dim (full MXU lanes)
    Ep = _round_up(E, 128)   # lane-dense output stores (no vst.msk)

    xm = x.reshape(M, K).astype(compute_dtype)
    if Kp != K:
        # Zero columns; XLA fuses the pad with the patchify copy above.
        xm = jnp.pad(xm, ((0, 0), (0, Kp - K)))

    wm = weight.reshape(E, K).T.astype(compute_dtype)           # (K, E)
    wm = jnp.pad(wm, ((0, Kp - K), (0, Ep - E)))                # (Kp, Ep)
    bm = jnp.pad(bias.astype(jnp.float32).reshape(1, E), ((0, 0), (0, Ep - E)))

    # Token tile: no explicit M padding — cdiv grid, Pallas masks the ragged
    # last block. When M is small use one full-extent block (block dim ==
    # array dim is always legal, regardless of (8,128) divisibility).
    tm_eff = tm if M > tm else M
    grid_m = pl.cdiv(M, tm_eff)

    in_bytes = jnp.dtype(compute_dtype).itemsize
    out_bytes = jnp.dtype(out_dtype).itemsize
    # Double-buffered token/output tiles + resident weight/bias (+ slack).
    vmem_needed = (2 * tm_eff * Kp * in_bytes
                   + 2 * Kp * Ep * in_bytes
                   + 2 * Ep * 4
                   + 2 * tm_eff * Ep * out_bytes)
    # Raise the scoped-VMEM limit past the 16/32 MiB defaults but stay under
    # v7x's 64 MiB physical VMEM unless the tiles genuinely need more.
    vmem_limit = int(min(max(vmem_needed + (4 << 20), 8 << 20), 100 << 20))

    cost = pl.CostEstimate(
        flops=2 * M * Kp * Ep,
        transcendentals=0,
        bytes_accessed=(M * Kp * in_bytes + Kp * Ep * in_bytes
                        + M * Ep * out_bytes),
    )

    out = pl.pallas_call(
        _patch_proj_kernel,
        out_shape=jax.ShapeDtypeStruct((M, Ep), out_dtype),
        grid_spec=pltpu.PrefetchScalarGridSpec(
            num_scalar_prefetch=0,
            grid=(grid_m,),
            in_specs=[
                pl.BlockSpec((tm_eff, Kp), lambda i: (i, 0)),  # token tile
                # Weight/bias index_maps are grid-invariant -> fetched once and
                # kept resident across the grid. On VMEM-tight v7x configs
                # (large K*E) add pipeline_mode=pl.Buffered(1) here to drop the
                # unused second buffer of the resident weight.
                pl.BlockSpec((Kp, Ep), lambda i: (0, 0)),      # full weight
                pl.BlockSpec((1, Ep), lambda i: (0, 0)),       # bias
            ],
            out_specs=pl.BlockSpec((tm_eff, Ep), lambda i: (i, 0)),
        ),
        compiler_params=pltpu.CompilerParams(
            dimension_semantics=("parallel",),   # sharded over v7x's 2 TCs
            vmem_limit_bytes=vmem_limit,
        ),
        cost_estimate=cost,
    )(xm, wm, bm)

    if Ep != E:
        out = out[:, :E]
    return out.reshape(B, Ho * Wo, E)


if __name__ == "__main__":
    # Small, shape-consistent example: dim=2, in_channels=4, patch_size=[4,4],
    # embed_dim=32, input (B=2, C=4, H=16, W=16), wrap padding [[2,2],[2,2]].
    key = jax.random.PRNGKey(0)
    kx, kw, kb = jax.random.split(key, 3)

    B, C, H, W = 2, 4, 16, 16
    patch_size = [4, 4]
    embed_dim = 32
    pad_size = [[2, 2], [2, 2]]

    x = jax.random.normal(kx, (B, C, H, W), dtype=jnp.float32)
    weight = jax.random.normal(
        kw, (embed_dim, C, patch_size[0], patch_size[1]), dtype=jnp.float32
    ) * 0.05
    bias = jax.random.normal(kb, (embed_dim,), dtype=jnp.float32) * 0.05

    # Reference: wrap pad + VALID strided conv + flatten(2).transpose(1, 2).
    xp = _wrap_pad_2d(x, pad_size)
    ref = jax.lax.conv_general_dilated(
        xp, weight,
        window_strides=tuple(patch_size),
        padding="VALID",
        dimension_numbers=("NCHW", "OIHW", "NCHW"),
    ) + bias[None, :, None, None]
    ref = ref.reshape(B, embed_dim, -1).transpose(0, 2, 1)

    # 1) f32, single full-extent token block (M < tm).
    out = jax.block_until_ready(
        patch_embed_2d(x, weight, bias, patch_size, pad_size))
    assert out.shape == ref.shape, (out.shape, ref.shape)
    assert jnp.allclose(out, ref, atol=1e-4, rtol=1e-4), float(
        jnp.max(jnp.abs(out - ref)))

    # 2) f32, multi-block grid with a ragged last block (exercises masking).
    out_tiled = jax.block_until_ready(
        patch_embed_2d(x, weight, bias, patch_size, pad_size, tm=16))
    assert jnp.allclose(out_tiled, ref, atol=1e-4, rtol=1e-4), float(
        jnp.max(jnp.abs(out_tiled - ref)))

    # 3) bf16 streaming inputs, f32 MXU accumulation (production path).
    out_bf16 = jax.block_until_ready(
        patch_embed_2d(x, weight, bias, patch_size, pad_size,
                       compute_dtype=jnp.bfloat16))
    assert jnp.allclose(out_bf16, ref, atol=5e-2, rtol=5e-2), float(
        jnp.max(jnp.abs(out_bf16 - ref)))

    print("KERNEL_OK")
</pallas_src>

<mosaic_0001>
module attributes {stable_mosaic.version = 11 : i64} {
  func.func @_patch_proj_kernel(%arg0: i32, %arg1: memref<50x128xf32, #tpu.memory_space<vmem>>, %arg2: memref<128x128xf32, #tpu.memory_space<vmem>>, %arg3: memref<1x128xf32, #tpu.memory_space<vmem>>, %arg4: memref<50x128xf32, #tpu.memory_space<vmem>>) attributes {dimension_semantics = [#tpu.dimension_semantics<parallel>], iteration_bounds = array<i64: 1>, scalar_prefetch = 0 : i64, scratch_operands = 0 : i64, tpu.core_type = #tpu.core_type<tc>, window_params = [{transform_indices = @transform_0, window_bounds = array<i64: 50, 128>}, {pipeline_mode = #tpu.pipeline_mode<synchronous>, transform_indices = @transform_1, window_bounds = array<i64: 128, 128>}, {pipeline_mode = #tpu.pipeline_mode<synchronous>, transform_indices = @transform_2, window_bounds = array<i64: 1, 128>}, {transform_indices = @transform_3, window_bounds = array<i64: 50, 128>}]} {
    %c0 = arith.constant 0 : index
    %c0_0 = arith.constant 0 : index
    %0 = vector.load %arg1[%c0, %c0_0] : memref<50x128xf32, #tpu.memory_space<vmem>>, vector<50x128xf32>
    %c0_1 = arith.constant 0 : index
    %c0_2 = arith.constant 0 : index
    %1 = vector.load %arg2[%c0_1, %c0_2] : memref<128x128xf32, #tpu.memory_space<vmem>>, vector<128x128xf32>
    %cst = arith.constant dense<0.000000e+00> : vector<50x128xf32>
    %2 = tpu.matmul %0, %1, %cst {dimension_numbers = #tpu.dot_dimension_numbers<[1], [0], [0], [1], [0, 0, 1, 1], [], []>} : vector<50x128xf32>, vector<128x128xf32>, vector<50x128xf32> -> vector<50x128xf32>
    %c0_3 = arith.constant 0 : index
    %c0_4 = arith.constant 0 : index
    %3 = vector.load %arg3[%c0_3, %c0_4] : memref<1x128xf32, #tpu.memory_space<vmem>>, vector<1x128xf32>
    %4 = vector.broadcast %3 : vector<1x128xf32> to vector<50x128xf32>
    %5 = arith.addf %2, %4 : vector<50x128xf32>
    %c0_5 = arith.constant 0 : index
    %c0_6 = arith.constant 0 : index
    %6 = vector.load %arg4[%c0_5, %c0_6] : memref<50x128xf32, #tpu.memory_space<vmem>>, vector<50x128xf32>
    tpu.vector_store %arg4[%c0_5, %c0_6], %5 {strides = array<i32>} : memref<50x128xf32, #tpu.memory_space<vmem>>, vector<50x128xf32>,
    return
  }
  func.func @transform_0(%arg0: i32) -> (i32, i32) {
    %c0_i32 = arith.constant 0 : i32
    %c0_i32_0 = arith.constant 0 : i32
    return %arg0, %c0_i32 : i32, i32
  }
  func.func @transform_1(%arg0: i32) -> (i32, i32) {
    %c0_i32 = arith.constant 0 : i32
    %c0_i32_0 = arith.constant 0 : i32
    %c0_i32_1 = arith.constant 0 : i32
    return %c0_i32, %c0_i32_0 : i32, i32
  }
  func.func @transform_2(%arg0: i32) -> (i32, i32) {
    %c0_i32 = arith.constant 0 : i32
    %c0_i32_0 = arith.constant 0 : i32
    %c0_i32_1 = arith.constant 0 : i32
    return %c0_i32, %c0_i32_0 : i32, i32
  }
  func.func @transform_3(%arg0: i32) -> (i32, i32) {
    %c0_i32 = arith.constant 0 : i32
    %c0_i32_0 = arith.constant 0 : i32
    return %arg0, %c0_i32 : i32, i32
  }
}

</mosaic_0001>

<bundles_post_ra>
// kernel: tpu_custom_call.1
= control target key start
LH: loop header
LB: loop body
LE: loop exit
PB: predicated region body
PF: predicated region fallthrough
CT: control target
= control target key end

     0   :  { %8 = vsyncpa [#allocation3], 0  ;;  %s317_s0 = inlined_call_operand.hbm [shape: f32[50,128], index: 0, kind: input, shape index: {}]   ;;  %s318_s1 = inlined_call_operand.hbm [shape: f32[128,128], index: 1, kind: input, shape index: {}]   ;;  %s319_s2 = inlined_call_operand.vmem [shape: f32[1,128], index: 2, kind: input, shape index: {}]   ;;  %s320_s3 = inlined_call_operand.hbm [shape: f32[50,128], index: 3, kind: output, shape index: {}]  }
   0x1   :  { %9 = vsyncpa [#allocation6], 0 }
   0x2   :  { %10 = vsyncpa [#allocation4], 0  ;;  %s15_s14 = sshll.u32 %s317_s0, 4  ;;  %s271_s15 = smov [#allocation2]   ;;  %s16_s14 = int_to_ptr.hbm [resolvable:$true] %s15_s14 }
   0x3   :  { %s17_s16 = sshll.u32 %s271_s15, 4  ;;  %s28_s19 = sshll.u32 %s318_s1, 4  ;;  %s18_s16 = int_to_ptr.vmem [resolvable:$true] %s17_s16  ;;  %s29_s19 = int_to_ptr.hbm [resolvable:$true] %s28_s19 }
   0x4   :  { %s272_s20 = smov 128   ;;  %s273_s21 = smov 8  }
   0x5   :  { %23 = dma.hbm_to_vmem [thread:$0]  %s16_s14, 896, %s18_s16, [#allocation3], %s272_s20, %s272_s20, %s273_s21  }
   0x6   :  { %s274_s22 = smov [#allocation5]  }
   0x7   :  { %s30_s23 = sshll.u32 %s274_s22, 4  ;;  %s31_s23 = int_to_ptr.vmem [resolvable:$true] %s30_s23 }
   0x8   :  { %36 = dma.hbm_to_vmem [thread:$0]  %s29_s19, 2048, %s31_s23, [#allocation6], %s272_s20, %s272_s20, %s273_s21  }
   0x9   :  { %265 = dma.done.wait [#allocation3], 896  }
   0xa   :  { %266 = vsyncadd [#allocation3], 4294966400 }
   0xb   :  { %267 = dma.done.wait [#allocation6], 2048  }
   0xc   :  { %268 = vsyncadd [#allocation6], 4294965248  ;;  %v69_v0 = vld [vmem:[#allocation5 + $0x78] sm:$0xff]  ;;  %v68_v1 = vld [vmem:[#allocation5 + $0x70] sm:$0xff]  ;;  %s275_s24 = smov [#allocation7]  }
   0xd   :  { %140 = vmatpush.msra.mxu2 %v69_v0  ;;  %141 = vmatpush.msra.mxu3 %v69_v0  ;;  %v67_v2 = vld [vmem:[#allocation5 + $0x68] sm:$0xff]  ;;  %v66_v3 = vld [vmem:[#allocation5 + $0x60] sm:$0xff]  ;;  %v65_v4 = vld [vmem:[#allocation5 + $0x58] sm:$0xff]  ;;  %s123_s25 = sshll.u32 %s275_s24, 4  ;;  %s124_s25 = int_to_ptr.vmem [resolvable:$true] %s123_s25 }
   0xe   :  { %74 = vmatpush.msra.mxu0 %v69_v0  ;;  %139 = vmatpush.msra.mxu1 %v69_v0  ;;  %v64_v5 = vld [vmem:[#allocation5 + $0x50] sm:$0xff]  ;;  %v63_v6 = vld [vmem:[#allocation5 + $0x48] sm:$0xff]  ;;  %v62_v7 = vld [vmem:[#allocation5 + $0x40] sm:$0xff] }
   0xf   :  { %143 = vmatpush.msra.mxu2 %v68_v1  ;;  %144 = vmatpush.msra.mxu3 %v68_v1  ;;  %v61_v8 = vld [vmem:[#allocation5 + $0x38] sm:$0xff]  ;;  %v60_v9 = vld [vmem:[#allocation5 + $0x30] sm:$0xff]  ;;  %v59_v10 = vld [vmem:[#allocation5 + $0x28] sm:$0xff] }
  0x10   :  { %75 = vmatpush.msra.mxu0 %v68_v1  ;;  %142 = vmatpush.msra.mxu1 %v68_v1  ;;  %v58_v11 = vld [vmem:[#allocation5 + $0x20] sm:$0xff]  ;;  %v57_v12 = vld [vmem:[#allocation5 + $0x18] sm:$0xff]  ;;  %v56_v13 = vld [vmem:[#allocation5 + $0x10] sm:$0xff] }
  0x11   :  { %146 = vmatpush.msra.mxu2 %v67_v2  ;;  %147 = vmatpush.msra.mxu3 %v67_v2  ;;  %v55_v14 = vld [vmem:[#allocation5 + $0x8] sm:$0xff]  ;;  %v54_v15 = vld [vmem:[#allocation5] sm:$0xff]  ;;  %v52_v17 = vld [vmem:[#allocation2 + $0x28] sm:$0xff] }
  0x12   :  { %76 = vmatpush.msra.mxu0 %v67_v2  ;;  %145 = vmatpush.msra.mxu1 %v67_v2  ;;  %v50_v16 = vld [vmem:[#allocation2 + $0x18] sm:$0xff]  ;;  %v47_v18 = vld [vmem:[#allocation2] sm:$0xff]  ;;  %v49_v19 = vld [vmem:[#allocation2 + $0x10] sm:$0xff] }
  0x13   :  { %149 = vmatpush.msra.mxu2 %v66_v3  ;;  %150 = vmatpush.msra.mxu3 %v66_v3  ;;  %v51_v20 = vld [vmem:[#allocation2 + $0x20] sm:$0xff]  ;;  %v53_v21 = vld [vmem:[#allocation2 + $0x30] sm:$0x3]  ;;  %v48_v22 = vld [vmem:[#allocation2 + $0x8] sm:$0xff] }
  0x14   :  { %77 = vmatpush.msra.mxu0 %v66_v3  ;;  %148 = vmatpush.msra.mxu1 %v66_v3  ;;  %v192_v23 = vld [vmem:[%s319_s2] ss:$0 sm:$0xff]  ;;  %s125_s2 = sshll.u32 %s320_s3, 4  ;;  %s126_s2 = int_to_ptr.hbm [resolvable:$true] %s125_s2 }
  0x15   :  { %152 = vmatpush.msra.mxu2 %v65_v4  ;;  %153 = vmatpush.msra.mxu3 %v65_v4 }
  0x16   :  { %78 = vmatpush.msra.mxu0 %v65_v4  ;;  %151 = vmatpush.msra.mxu1 %v65_v4 }
  0x17   :  { %155 = vmatpush.msra.mxu2 %v64_v5  ;;  %156 = vmatpush.msra.mxu3 %v64_v5 }
  0x18   :  { %79 = vmatpush.msra.mxu0 %v64_v5  ;;  %154 = vmatpush.msra.mxu1 %v64_v5 }
  0x19   :  { %158 = vmatpush.msra.mxu2 %v63_v6  ;;  %159 = vmatpush.msra.mxu3 %v63_v6 }
  0x1a   :  { %80 = vmatpush.msra.mxu0 %v63_v6  ;;  %157 = vmatpush.msra.mxu1 %v63_v6 }
  0x1b   :  { %161 = vmatpush.msra.mxu2 %v62_v7  ;;  %162 = vmatpush.msra.mxu3 %v62_v7 }
  0x1c   :  { %81 = vmatpush.msra.mxu0 %v62_v7  ;;  %160 = vmatpush.msra.mxu1 %v62_v7 }
  0x1d   :  { %164 = vmatpush.msra.mxu2 %v61_v8  ;;  %165 = vmatpush.msra.mxu3 %v61_v8 }
  0x1e   :  { %82 = vmatpush.msra.mxu0 %v61_v8  ;;  %163 = vmatpush.msra.mxu1 %v61_v8 }
  0x1f   :  { %167 = vmatpush.msra.mxu2 %v60_v9  ;;  %168 = vmatpush.msra.mxu3 %v60_v9 }
  0x20   :  { %83 = vmatpush.msra.mxu0 %v60_v9  ;;  %166 = vmatpush.msra.mxu1 %v60_v9 }
  0x21   :  { %170 = vmatpush.msra.mxu2 %v59_v10  ;;  %171 = vmatpush.msra.mxu3 %v59_v10 }
  0x22   :  { %84 = vmatpush.msra.mxu0 %v59_v10  ;;  %169 = vmatpush.msra.mxu1 %v59_v10 }
  0x23   :  { %173 = vmatpush.msra.mxu2 %v58_v11  ;;  %174 = vmatpush.msra.mxu3 %v58_v11 }
  0x24   :  { %85 = vmatpush.msra.mxu0 %v58_v11  ;;  %172 = vmatpush.msra.mxu1 %v58_v11 }
  0x25   :  { %176 = vmatpush.msra.mxu2 %v57_v12  ;;  %177 = vmatpush.msra.mxu3 %v57_v12 }
  0x26   :  { %86 = vmatpush.msra.mxu0 %v57_v12  ;;  %175 = vmatpush.msra.mxu1 %v57_v12 }
  0x27   :  { %179 = vmatpush.msra.mxu2 %v56_v13  ;;  %180 = vmatpush.msra.mxu3 %v56_v13 }
  0x28   :  { %87 = vmatpush.msra.mxu0 %v56_v13  ;;  %178 = vmatpush.msra.mxu1 %v56_v13 }
  0x29   :  { %182 = vmatpush.msra.mxu2 %v55_v14  ;;  %183 = vmatpush.msra.mxu3 %v55_v14 }
  0x2a   :  { %88 = vmatpush.msra.mxu0 %v55_v14  ;;  %181 = vmatpush.msra.mxu1 %v55_v14 }
  0x2b   :  { %185 = vmatpush.msra.mxu2 %v54_v15  ;;  %186 = vmatpush.msra.mxu3 %v54_v15 }
  0x2c   :  { %99 = vmatmul.f32.vlgmr.msra.gmra.mxu2 %v50_v16  ;;  %105 = vmatmul.f32.vlgmr.msra.gmra.mxu3 %v52_v17 }
  0x2d   :  { %89 = vmatpush.msra.mxu0 %v54_v15  ;;  %184 = vmatpush.msra.mxu1 %v54_v15 }
  0x2e   :  { %90 = vmatmul.f32.vlgmr.msra.gmra.mxu0 %v47_v18  ;;  %96 = vmatmul.f32.vlgmr.msra.gmra.mxu1 %v49_v19 }
  0x34   :  { %102 = vmatmul.f32.gmra.mxu2 %v51_v20  ;;  %108 = vmatmul.f32.gmra.mxu3 %v53_v21 }
  0x36   :  { %93 = vmatmul.f32.gmra.mxu0 %v48_v22 }
  0xab   :  { %v91_v24 = vpop.f32.mrf.mxu0  ;;  %v97_v25 = vpop.f32.mrf.mxu1 }
  0xac   :  { %v92_v26 = vadd.f32 %v192_v23, %v91_v24  ;;  %v98_v27 = vadd.f32 %v192_v23, %v97_v25 }
  0xae   :  { %112 = vst [vmem:[#allocation7] sm:$0xff] %v92_v26 }
  0xaf   :  { %v100_v28 = vpop.f32.mrf.mxu2  ;;  %v106_v29 = vpop.f32.mrf.mxu3  ;;  %114 = vst [vmem:[#allocation7 + $0x10] sm:$0xff] %v98_v27 }
  0xb0   :  { %v101_v30 = vadd.f32 %v192_v23, %v100_v28  ;;  %v107_v31 = vadd.f32 %v192_v23, %v106_v29 }
  0xb2   :  { %115 = vst [vmem:[#allocation7 + $0x18] sm:$0xff] %v101_v30 }
  0xb3   :  { %117 = vst [vmem:[#allocation7 + $0x28] sm:$0xff] %v107_v31  ;;  %v94_v32 = vpop.f32.mrf.mxu0 }
  0xb4   :  { %v95_v33 = vadd.f32 %v192_v23, %v94_v32 }
  0xb6   :  { %113 = vst [vmem:[#allocation7 + $0x8] sm:$0xff] %v95_v33 }
  0xb7   :  { %v103_v34 = vpop.f32.mrf.mxu2  ;;  %v109_v35 = vpop.f32.mrf.mxu3 }
  0xb8   :  { %v104_v36 = vadd.f32 %v192_v23, %v103_v34  ;;  %v110_v37 = vadd.f32 %v192_v23, %v109_v35 }
  0xba   :  { %116 = vst [vmem:[#allocation7 + $0x20] sm:$0xff] %v104_v36 }
  0xbb   :  { %118 = vst [vmem:[#allocation7 + $0x30] sm:$0x3] %v110_v37 }
  0xbc   :  { %131 = dma.vmem_to_hbm [thread:$0]  %s124_s25, 896, %s126_s2, [#allocation4], %s272_s20, %s272_s20, %s273_s21  }
  0xbd   :  { %269 = dma.done.wait [#allocation4], 896  }
  0xbe   :  { %270 = vsyncadd [#allocation4], 4294966400 }
  0xbf   :  { %136 = vsyncpa [#allocation3], 1 }
  0xc0   :  { %137 = vsyncpa [#allocation6], 1 }
  0xc1   :  { %138 = vsyncpa [#allocation4], 1 }

</bundles_post_ra>
